<compile_context>
chip_gen: v5e
topology: v5e:2x2
jax: 0.10.0
libtpu: 0.0.40
codegen_flags: <defaults>
</compile_context>

<pallas_src>
import functools

import jax
import jax.numpy as jnp
from jax.experimental import pallas as pl
from jax.experimental.pallas import tpu as pltpu


def _round_up(x, m):
    return (x + m - 1) // m * m


def _loss_partial_kernel(pred_ref, targ_ref, w2_ref, out_ref, *, n_rows):
    """Per-column partial sums for one (r_tile, T) row block.

    out_ref block (1, 4, T):
      row 0: sum_r err^2          per time column
      row 1: sum_r |err|          per time column
      row 2: sum_r w^2 * err^2    per time column
      row 3: sum_r diff_t(err)^2  per time column (wrap column zeroed)
    """
    i = pl.program_id(0)

    p = pred_ref[...].astype(jnp.float32)
    t = targ_ref[...].astype(jnp.float32)
    r_tile, T = p.shape
    rows_left = n_rows - i * r_tile  # scalar; >= r_tile except on the tail block

    # Mask the (garbage) padded rows of a partial last block.
    row_id = jax.lax.broadcasted_iota(jnp.int32, (r_tile, 1), 0)
    valid = row_id < rows_left
    err = jnp.where(valid, p - t, 0.0)
    w2 = jnp.where(valid, w2_ref[...], 0.0)

    err2 = err * err
    col_sq = jnp.sum(err2, axis=0, keepdims=True)            # (1, T)
    col_abs = jnp.sum(jnp.abs(err), axis=0, keepdims=True)   # (1, T)
    col_wsq = jnp.sum(err2 * w2, axis=0, keepdims=True)      # (1, T)

    out_ref[0, 0:1, :] = col_sq
    out_ref[0, 1:2, :] = col_abs
    out_ref[0, 2:3, :] = col_wsq

    # Temporal consistency: diff(pred, -1) - diff(target, -1) == diff(err, -1).
    # TODO(synk): for v7x + bf16 inputs the reductions above could move to the
    # idle MXU (ones/w2 row-vector dots) if the kernel flips to VPU-bound.
    if T % 128 == 0:
        # Lane-aligned: XLU rotate.  The wrap-around term contributes exactly
        # sum_r (err[:,0]-err[:,T-1])^2 to the block total in exactly one
        # column (whichever the roll direction puts it in); since only the
        # global sum matters, subtract it from column 0 analytically.
        rolled = pltpu.roll(err, shift=1, axis=1)
        cd = err - rolled
        col_cd = jnp.sum(cd * cd, axis=0, keepdims=True)          # (1, T)
        wrap = err[:, 0:1] - err[:, T - 1:T]
        wrap_sum = jnp.sum(wrap * wrap, axis=0, keepdims=True)    # (1, 1)
        lane = jax.lax.broadcasted_iota(jnp.int32, (1, T), 1)
        col_cd = col_cd - jnp.where(lane == 0, wrap_sum, 0.0)
        out_ref[0, 3:4, :] = col_cd
    elif T > 1:
        # Unaligned T: slice-based diff (small relayout cost, correctness-safe).
        cd = err[:, 1:] - err[:, :-1]
        out_ref[0, 3:4, 0:1] = jnp.zeros((1, 1), jnp.float32)
        out_ref[0, 3:4, 1:] = jnp.sum(cd * cd, axis=0, keepdims=True)
    else:
        out_ref[0, 3:4, :] = jnp.zeros((1, T), jnp.float32)


def enhanced_spectrogram_loss(predicted, target,
                              mse_weight=1.0, mae_weight=0.1,
                              perceptual_weight=0.05, consistency_weight=0.02,
                              target_block_bytes=4 << 20):
    assert predicted.shape == target.shape
    B, C, F, T = predicted.shape
    N = B * C * F

    # Flatten rows (B, C, F): the time diff is along T only, so this is
    # loss-preserving; keep the input dtype (kernel casts to f32 after load).
    pred = predicted.reshape(N, T)
    targ = target.reshape(N, T)

    # Squared frequency weights per flattened row (depend only on the F index).
    w = jnp.linspace(1.0, 0.1, F, dtype=jnp.float32)
    w2_rows = jnp.tile(w * w, (B * C,)).reshape(N, 1)

    # Row tile: multiple of the dtype sublane pack, ~target_block_bytes/input.
    itemsize = jnp.dtype(predicted.dtype).itemsize
    sub = {4: 8, 2: 16, 1: 32}.get(itemsize, 8)
    bytes_per_row = max(T * itemsize, 1)
    r_tile = (target_block_bytes // bytes_per_row) // sub * sub
    r_tile = max(sub, min(r_tile, _round_up(N, sub)))
    n_blocks = pl.cdiv(N, r_tile)
    # TODO(synk): for extremely long T (an (8, T) stripe above a few MiB) also
    # tile the time axis (2-D grid, carried boundary column for the diff).

    # Scoped-VMEM budget: 2 inputs x 2 pipeline buffers x block, plus headroom
    # for the f32 err / err^2 / diff temporaries.  Cap at 60 MiB (v7x physical
    # VMEM is 64 MiB); v5e/v6e have 128 MiB physical so the raise is safe.
    in_block_bytes = r_tile * T * itemsize
    f32_block_bytes = r_tile * T * 4
    vmem_bytes = 2 * 2 * in_block_bytes + 5 * f32_block_bytes + (2 << 20)
    vmem_bytes = int(min(max(vmem_bytes, 16 << 20), 60 << 20))

    kernel = functools.partial(_loss_partial_kernel, n_rows=N)

    partials = pl.pallas_call(
        kernel,
        out_shape=jax.ShapeDtypeStruct((n_blocks, 4, T), jnp.float32),
        grid_spec=pltpu.PrefetchScalarGridSpec(
            num_scalar_prefetch=0,
            grid=(n_blocks,),
            in_specs=[
                pl.BlockSpec((r_tile, T), lambda i: (i, 0)),
                pl.BlockSpec((r_tile, T), lambda i: (i, 0)),
                pl.BlockSpec((r_tile, 1), lambda i: (i, 0)),
            ],
            out_specs=pl.BlockSpec((1, 4, T), lambda i: (i, 0, 0)),
        ),
        compiler_params=pltpu.CompilerParams(
            dimension_semantics=("parallel",),
            vmem_limit_bytes=vmem_bytes),
    )(pred, targ, w2_rows)

    sums = jnp.sum(partials, axis=(0, 2))  # (4,) — one tiny XLA reduction

    n_full = float(N * T)
    mse = sums[0] / n_full
    mae = sums[1] / n_full
    perceptual = sums[2] / n_full
    if T > 1:
        consistency = sums[3] / float(N * (T - 1))
    else:
        # Guard the T == 1 divide-by-zero (PyTorch would return NaN here).
        consistency = jnp.float32(0.0)

    total = (mse_weight * mse + mae_weight * mae
             + perceptual_weight * perceptual + consistency_weight * consistency)

    return {
        'total_loss': total,
        'mse_loss': mse,
        'mae_loss': mae,
        'perceptual_loss': perceptual,
        'consistency_loss': consistency,
    }


def _reference(predicted, target):
    """Pure-JAX reference mirroring the PyTorch module."""
    F = predicted.shape[2]
    w = jnp.linspace(1.0, 0.1, F, dtype=jnp.float32).reshape(1, 1, F, 1)
    err = predicted.astype(jnp.float32) - target.astype(jnp.float32)
    mse = jnp.mean(err ** 2)
    mae = jnp.mean(jnp.abs(err))
    perceptual = jnp.mean((err * w) ** 2)
    pd = jnp.diff(predicted.astype(jnp.float32), axis=-1)
    td = jnp.diff(target.astype(jnp.float32), axis=-1)
    consistency = jnp.mean((pd - td) ** 2)
    total = 1.0 * mse + 0.1 * mae + 0.05 * perceptual + 0.02 * consistency
    return {'total_loss': total, 'mse_loss': mse, 'mae_loss': mae,
            'perceptual_loss': perceptual, 'consistency_loss': consistency}


if __name__ == "__main__":
    key = jax.random.PRNGKey(0)
    k1, k2 = jax.random.split(key)
    B, C, F, T = 2, 4, 16, 16
    predicted = jax.random.normal(k1, (B, C, F, T), dtype=jnp.float32)
    target = jax.random.normal(k2, (B, C, F, T), dtype=jnp.float32)

    out = enhanced_spectrogram_loss(predicted, target)
    out = jax.tree_util.tree_map(jax.block_until_ready, out)

    ref = _reference(predicted, target)
    for k in out:
        assert jnp.allclose(out[k], ref[k], rtol=1e-5, atol=1e-5), (
            f"mismatch in {k}: {out[k]} vs {ref[k]}")

    print("KERNEL_OK")
</pallas_src>

<mosaic_0001>
module attributes {stable_mosaic.version = 11 : i64} {
  func.func @_loss_partial_kernel(%arg0: i32, %arg1: memref<128x16xf32, #tpu.memory_space<vmem>>, %arg2: memref<128x16xf32, #tpu.memory_space<vmem>>, %arg3: memref<128x1xf32, #tpu.memory_space<vmem>>, %arg4: memref<1x4x16xf32, #tpu.memory_space<vmem>>) attributes {dimension_semantics = [#tpu.dimension_semantics<parallel>], iteration_bounds = array<i64: 1>, scalar_prefetch = 0 : i64, scratch_operands = 0 : i64, tpu.core_type = #tpu.core_type<tc>, window_params = [{transform_indices = @transform_0, window_bounds = array<i64: 128, 16>}, {transform_indices = @transform_1, window_bounds = array<i64: 128, 16>}, {transform_indices = @transform_2, window_bounds = array<i64: 128, 1>}, {transform_indices = @transform_3, window_bounds = array<i64: 1, 4, 16>}]} {
    %c0 = arith.constant 0 : index
    %c0_0 = arith.constant 0 : index
    %0 = vector.load %arg1[%c0, %c0_0] : memref<128x16xf32, #tpu.memory_space<vmem>>, vector<128x16xf32>
    %c0_1 = arith.constant 0 : index
    %c0_2 = arith.constant 0 : index
    %1 = vector.load %arg2[%c0_1, %c0_2] : memref<128x16xf32, #tpu.memory_space<vmem>>, vector<128x16xf32>
    %c128_i32 = arith.constant 128 : i32
    %2 = arith.muli %arg0, %c128_i32 : i32
    %c128_i32_3 = arith.constant 128 : i32
    %3 = arith.subi %c128_i32_3, %2 : i32
    %4 = tpu.iota {dimensions = array<i32: 0>} : vector<128x1xi32>
    %5 = vector.broadcast %3 : i32 to vector<128x1xi32>
    %6 = arith.cmpi slt, %4, %5 : vector<128x1xi32>
    %7 = arith.subf %0, %1 : vector<128x16xf32>
    %cst = arith.constant 0.000000e+00 : f32
    %8 = vector.shape_cast %6 : vector<128x1xi1> to vector<128x1xi1>
    %9 = vector.broadcast %8 : vector<128x1xi1> to vector<128x16xi1>
    %10 = vector.broadcast %cst : f32 to vector<128x16xf32>
    %11 = arith.select %9, %7, %10 : vector<128x16xi1>, vector<128x16xf32>
    %c0_4 = arith.constant 0 : index
    %c0_5 = arith.constant 0 : index
    %12 = vector.load %arg3[%c0_4, %c0_5] : memref<128x1xf32, #tpu.memory_space<vmem>>, vector<128x1xf32>
    %cst_6 = arith.constant 0.000000e+00 : f32
    %13 = vector.broadcast %cst_6 : f32 to vector<128x1xf32>
    %14 = arith.select %6, %12, %13 : vector<128x1xi1>, vector<128x1xf32>
    %15 = arith.mulf %11, %11 : vector<128x16xf32>
    %cst_7 = arith.constant dense<0.000000e+00> : vector<16xf32>
    %16 = vector.multi_reduction <add>, %15, %cst_7 [0] : vector<128x16xf32> to vector<16xf32>
    %17 = vector.shape_cast %16 : vector<16xf32> to vector<1x16xf32>
    %18 = math.absf %11 : vector<128x16xf32>
    %cst_8 = arith.constant dense<0.000000e+00> : vector<16xf32>
    %19 = vector.multi_reduction <add>, %18, %cst_8 [0] : vector<128x16xf32> to vector<16xf32>
    %20 = vector.shape_cast %19 : vector<16xf32> to vector<1x16xf32>
    %21 = vector.broadcast %14 : vector<128x1xf32> to vector<128x16xf32>
    %22 = arith.mulf %15, %21 : vector<128x16xf32>
    %cst_9 = arith.constant dense<0.000000e+00> : vector<16xf32>
    %23 = vector.multi_reduction <add>, %22, %cst_9 [0] : vector<128x16xf32> to vector<16xf32>
    %24 = vector.shape_cast %23 : vector<16xf32> to vector<1x16xf32>
    %c0_10 = arith.constant 0 : index
    %c0_11 = arith.constant 0 : index
    %c0_12 = arith.constant 0 : index
    %25 = vector.load %arg4[%c0_10, %c0_11, %c0_12] : memref<1x4x16xf32, #tpu.memory_space<vmem>>, vector<1x1x16xf32>
    %26 = vector.shape_cast %25 : vector<1x1x16xf32> to vector<1x16xf32>
    %27 = vector.shape_cast %17 : vector<1x16xf32> to vector<1x1x16xf32>
    tpu.vector_store %arg4[%c0_10, %c0_11, %c0_12], %27 {strides = array<i32>} : memref<1x4x16xf32, #tpu.memory_space<vmem>>, vector<1x1x16xf32>,
    %c0_13 = arith.constant 0 : index
    %c1 = arith.constant 1 : index
    %c0_14 = arith.constant 0 : index
    %28 = vector.load %arg4[%c0_13, %c1, %c0_14] : memref<1x4x16xf32, #tpu.memory_space<vmem>>, vector<1x1x16xf32>
    %29 = vector.shape_cast %28 : vector<1x1x16xf32> to vector<1x16xf32>
    %30 = vector.shape_cast %20 : vector<1x16xf32> to vector<1x1x16xf32>
    tpu.vector_store %arg4[%c0_13, %c1, %c0_14], %30 {strides = array<i32>} : memref<1x4x16xf32, #tpu.memory_space<vmem>>, vector<1x1x16xf32>,
    %c0_15 = arith.constant 0 : index
    %c2 = arith.constant 2 : index
    %c0_16 = arith.constant 0 : index
    %31 = vector.load %arg4[%c0_15, %c2, %c0_16] : memref<1x4x16xf32, #tpu.memory_space<vmem>>, vector<1x1x16xf32>
    %32 = vector.shape_cast %31 : vector<1x1x16xf32> to vector<1x16xf32>
    %33 = vector.shape_cast %24 : vector<1x16xf32> to vector<1x1x16xf32>
    tpu.vector_store %arg4[%c0_15, %c2, %c0_16], %33 {strides = array<i32>} : memref<1x4x16xf32, #tpu.memory_space<vmem>>, vector<1x1x16xf32>,
    %34 = vector.extract_strided_slice %11 {offsets = [0, 1], sizes = [128, 15], strides = [1, 1]} : vector<128x16xf32> to vector<128x15xf32>
    %35 = vector.extract_strided_slice %11 {offsets = [0, 0], sizes = [128, 15], strides = [1, 1]} : vector<128x16xf32> to vector<128x15xf32>
    %36 = arith.subf %34, %35 : vector<128x15xf32>
    %cst_17 = arith.constant 0.000000e+00 : f32
    %37 = vector.broadcast %cst_17 : f32 to vector<1x1xf32>
    %c0_18 = arith.constant 0 : index
    %c3 = arith.constant 3 : index
    %c0_19 = arith.constant 0 : index
    %38 = vector.load %arg4[%c0_18, %c3, %c0_19] : memref<1x4x16xf32, #tpu.memory_space<vmem>>, vector<1x1x1xf32>
    %39 = vector.shape_cast %38 : vector<1x1x1xf32> to vector<1x1xf32>
    %40 = vector.shape_cast %37 : vector<1x1xf32> to vector<1x1x1xf32>
    tpu.vector_store %arg4[%c0_18, %c3, %c0_19], %40 {strides = array<i32>} : memref<1x4x16xf32, #tpu.memory_space<vmem>>, vector<1x1x1xf32>,
    %41 = arith.mulf %36, %36 : vector<128x15xf32>
    %cst_20 = arith.constant dense<0.000000e+00> : vector<15xf32>
    %42 = vector.multi_reduction <add>, %41, %cst_20 [0] : vector<128x15xf32> to vector<15xf32>
    %43 = vector.shape_cast %42 : vector<15xf32> to vector<1x15xf32>
    %c0_21 = arith.constant 0 : index
    %c3_22 = arith.constant 3 : index
    %c1_23 = arith.constant 1 : index
    %44 = vector.load %arg4[%c0_21, %c3_22, %c1_23] : memref<1x4x16xf32, #tpu.memory_space<vmem>>, vector<1x1x15xf32>
    %45 = vector.shape_cast %44 : vector<1x1x15xf32> to vector<1x15xf32>
    %46 = vector.shape_cast %43 : vector<1x15xf32> to vector<1x1x15xf32>
    tpu.vector_store %arg4[%c0_21, %c3_22, %c1_23], %46 {strides = array<i32>} : memref<1x4x16xf32, #tpu.memory_space<vmem>>, vector<1x1x15xf32>,
    return
  }
  func.func @transform_0(%arg0: i32) -> (i32, i32) {
    %c0_i32 = arith.constant 0 : i32
    %c0_i32_0 = arith.constant 0 : i32
    return %arg0, %c0_i32 : i32, i32
  }
  func.func @transform_1(%arg0: i32) -> (i32, i32) {
    %c0_i32 = arith.constant 0 : i32
    %c0_i32_0 = arith.constant 0 : i32
    return %arg0, %c0_i32 : i32, i32
  }
  func.func @transform_2(%arg0: i32) -> (i32, i32) {
    %c0_i32 = arith.constant 0 : i32
    %c0_i32_0 = arith.constant 0 : i32
    return %arg0, %c0_i32 : i32, i32
  }
  func.func @transform_3(%arg0: i32) -> (i32, i32, i32) {
    %c0_i32 = arith.constant 0 : i32
    %c0_i32_0 = arith.constant 0 : i32
    %c0_i32_1 = arith.constant 0 : i32
    return %arg0, %c0_i32, %c0_i32_0 : i32, i32, i32
  }
}

</mosaic_0001>

<bundles_post_ra>
// kernel: tpu_custom_call.1
= control target key start
LH: loop header
LB: loop body
LE: loop exit
PB: predicated region body
PF: predicated region fallthrough
CT: control target
= control target key end

     0   :  { %v610_v3 = vmov 0   ;;  %s1063_s0 = inlined_call_operand.vmem [shape: f32[128,16], index: 0, kind: input, shape index: {}]   ;;  %s1064_s1 = inlined_call_operand.vmem [shape: f32[128,16], index: 1, kind: input, shape index: {}]   ;;  %s1065_s2 = inlined_call_operand.vmem [shape: f32[128,1], index: 2, kind: input, shape index: {}]   ;;  %s1066_s3 = inlined_call_operand.hbm [shape: f32[1,4,16], index: 3, kind: output, shape index: {}]  }
   0x1   :  { %v151_v0 = vld [vmem:[%s1065_s2 + $0x20] sm:$0xff]  ;;  %v149_v1 = vld [vmem:[%s1065_s2 + $0x10] sm:$0xff]  ;;  %583 = vset.pattern.permute.xlu2 %v610_v3  ;;  %582 = vset.pattern.permute.xlu1 %v610_v3  ;;  %v152_v4 = vld [vmem:[%s1065_s2 + $0x28] sm:$0xff] }
   0x2   :  { %v147_v2 = vld [vmem:[%s1065_s2] sm:$0xff]  ;;  %581 = vset.pattern.permute.xlu0 %v610_v3  ;;  %308 = vperm.xlu2 %583, %v151_v0  }
   0x3   :  { %298 = vperm.xlu1 %582, %v149_v1   ;;  %288 = vperm.xlu0 %581, %v147_v2  }
   0x4   :  { %8 = vsyncpa [#allocation3], 0  ;;  %v150_v5 = vld [vmem:[%s1065_s2 + $0x18] sm:$0xff]  ;;  %v148_v6 = vld [vmem:[%s1065_s2 + $0x8] sm:$0xff]  ;;  %s611_s13 = smov 1   ;;  %vm195_vm0 = vcmask 130048  }
   0x5   :  { %v155_v7 = vld [vmem:[%s1065_s2 + $0x40] sm:$0xff]  ;;  %v154_v8 = vld [vmem:[%s1065_s2 + $0x38] sm:$0xff]  ;;  %v153_v9 = vld [vmem:[%s1065_s2 + $0x30] sm:$0xff]  ;;  %vm521_vm1 = vcmask 130056   ;;  %vm503_vm2 = vcmask 0   ;;  %vm419_vm3 = vcmask 122880  }
   0x6   :  { %v16_v10 = vld [vmem:[%s1063_s0 + $0x8] sm:$0xff]  ;;  %v15_v12 = vld [vmem:[%s1063_s0] sm:$0xff]  ;;  %v17_v17 = vld [vmem:[%s1063_s0 + $0x10] sm:$0xff]  ;;  %s568_s30 = sshll.u32 %s1066_s3, 4  ;;  %vm559_vm4 = vcmask 122888   ;;  %s569_s30 = int_to_ptr.hbm [resolvable:$true] %s568_s30 }
   0x7   :  { %v32_v11 = vld [vmem:[%s1064_s1 + $0x8] sm:$0xff]  ;;  %v31_v13 = vld [vmem:[%s1064_s1] sm:$0xff]  ;;  %v33_v20 = vld [vmem:[%s1064_s1 + $0x10] sm:$0xff] }
   0x8   :  { %v673_v14 = vsub.f32 %v16_v10, %v32_v11  ;;  %v675_v15 = vsub.f32 %v15_v12, %v31_v13  ;;  %v156_v16 = vld [vmem:[%s1065_s2 + $0x48] sm:$0xff]  ;;  %v19_v18 = vld [vmem:[%s1063_s0 + $0x20] sm:$0xff]  ;;  %v18_v21 = vld [vmem:[%s1063_s0 + $0x18] sm:$0xff]  ;;  %v704_v24 = vsub.f32 %v17_v17, %v33_v20 }
   0x9   :  { %v35_v19 = vld [vmem:[%s1064_s1 + $0x20] sm:$0xff]  ;;  %v34_v22 = vld [vmem:[%s1064_s1 + $0x18] sm:$0xff]  ;;  %v20_v26 = vld [vmem:[%s1063_s0 + $0x28] sm:$0xff] }
   0xa   :  { %313 = vperm.xlu2 %583, %v152_v4   ;;  %v702_v23 = vsub.f32 %v19_v18, %v35_v19  ;;  %v706_v25 = vsub.f32 %v18_v21, %v34_v22  ;;  %v22_v27 = vld [vmem:[%s1063_s0 + $0x38] sm:$0xff]  ;;  %v36_v29 = vld [vmem:[%s1064_s1 + $0x28] sm:$0xff]  ;;  %v21_v30 = vld [vmem:[%s1063_s0 + $0x30] sm:$0xff]  ;;  %v234_v2 = vand.u32 2147483647, %v673_v14  ;;  %v855_v11 = vmul.f32 %v675_v15, %v675_v15 }
   0xb   :  { %303 = vperm.xlu1 %582, %v150_v5   ;;  %293 = vperm.xlu0 %581, %v148_v6   ;;  %v38_v28 = vld [vmem:[%s1064_s1 + $0x38] sm:$0xff]  ;;  %v37_v31 = vld [vmem:[%s1064_s1 + $0x30] sm:$0xff]  ;;  %v734_v33 = vsub.f32 %v20_v26, %v36_v29  ;;  %v23_v35 = vld [vmem:[%s1063_s0 + $0x40] sm:$0xff]  ;;  %v233_v3 = vand.u32 2147483647, %v675_v15  ;;  %v180_v12 = vmul.f32 %v673_v14, %v673_v14  ;;  %v866_v20 = vmul.f32 %v704_v24, %v704_v24 }
   0xc   :  { %v732_v32 = vsub.f32 %v22_v27, %v38_v28  ;;  %v736_v34 = vsub.f32 %v21_v30, %v37_v31  ;;  %v25_v36 = vld [vmem:[%s1063_s0 + $0x50] sm:$0xff]  ;;  %v39_v38 = vld [vmem:[%s1064_s1 + $0x40] sm:$0xff]  ;;  %v24_v39 = vld [vmem:[%s1063_s0 + $0x48] sm:$0xff]  ;;  %v250_v4 = vsel %vm195_vm0, %v234_v2, 0.0  ;;  %v235_v6 = vand.u32 2147483647, %v704_v24 }
   0xd   :  { %v41_v37 = vld [vmem:[%s1064_s1 + $0x50] sm:$0xff]  ;;  %v40_v40 = vld [vmem:[%s1064_s1 + $0x48] sm:$0xff]  ;;  %v764_v42 = vsub.f32 %v23_v35, %v39_v38  ;;  %v26_v44 = vld [vmem:[%s1063_s0 + $0x58] sm:$0xff]  ;;  %v249_v5 = vsel %vm195_vm0, %v233_v3, 0.0  ;;  %v236_v10 = vand.u32 2147483647, %v706_v25  ;;  %v878_v35 = vmul.f32 %v706_v25, %v706_v25 }
   0xe   :  { %v762_v41 = vsub.f32 %v25_v36, %v41_v37  ;;  %v766_v43 = vsub.f32 %v24_v39, %v40_v40  ;;  %v42_v45 = vld [vmem:[%s1064_s1 + $0x58] sm:$0xff]  ;;  %v157_v48 = vld [vmem:[%s1065_s2 + $0x50] sm:$0xff]  ;;  %v28_v49 = vld [vmem:[%s1063_s0 + $0x68] sm:$0xff]  ;;  %v197_v17 = vsel %vm195_vm0, %v180_v12, 0.0  ;;  %v237_v18 = vand.u32 2147483647, %v702_v23 }
   0xf   :  { %v158_v46 = vld [vmem:[%s1065_s2 + $0x58] sm:$0xff]  ;;  %v783_v47 = vsub.f32 %v26_v44, %v42_v45  ;;  %v44_v50 = vld [vmem:[%s1064_s1 + $0x68] sm:$0xff]  ;;  %v27_v51 = vld [vmem:[%s1063_s0 + $0x60] sm:$0xff]  ;;  %v254_v19 = vsel %vm195_vm0, %v236_v10, 0.0  ;;  %v199_v28 = vsel %vm195_vm0, %v866_v20, 0.0  ;;  %v201_v38 = vsel %vm195_vm0, %v878_v35, 0.0 }
  0x10   :  { %v43_v52 = vld [vmem:[%s1064_s1 + $0x60] sm:$0xff]  ;;  %v802_v53 = vsub.f32 %v28_v49, %v44_v50  ;;  %v29_v56 = vld [vmem:[%s1063_s0 + $0x70] sm:$0xff]  ;;  %v160_v60 = vld [vmem:[%s1065_s2 + $0x68] sm:$0xff]  ;;  %v256_v29 = vsel %vm195_vm0, %v237_v18, 0.0  ;;  %v238_v30 = vand.u32 2147483647, %v734_v33  ;;  %v886_v44 = vmul.f32 %v702_v23, %v702_v23 }
  0x11   :  { %v804_v54 = vsub.f32 %v27_v51, %v43_v52  ;;  %v159_v55 = vld [vmem:[%s1065_s2 + $0x60] sm:$0xff]  ;;  %v45_v57 = vld [vmem:[%s1064_s1 + $0x70] sm:$0xff]  ;;  %v30_v61 = vld [vmem:[%s1063_s0 + $0x78] sm:$0xff]  ;;  %v239_v40 = vand.u32 2147483647, %v736_v34  ;;  %v916_v10 = vmul.f32 %v732_v32, %v732_v32  ;;  %s613_s0 = smov [#allocation2]  }
  0x12   :  { %328 = vperm.xlu2 %583, %v155_v7   ;;  %v161_v58 = vld [vmem:[%s1065_s2 + $0x70] sm:$0xff]  ;;  %v822_v59 = vsub.f32 %v29_v56, %v45_v57  ;;  %v46_v62 = vld [vmem:[%s1064_s1 + $0x78] sm:$0xff]  ;;  %v251_v7 = vadd.f32 %v250_v4, %v249_v5  ;;  %v258_v39 = vsel %vm195_vm0, %v238_v30, 0.0  ;;  %v203_v50 = vsel %vm195_vm0, %v886_v44, 0.0  ;;  %s566_s1 = sshll.u32 %s613_s0, 4  ;;  %s567_s1 = int_to_ptr.vmem [resolvable:$true] %s566_s1 }
  0x13   :  { %323 = vperm.xlu1 %582, %v154_v8   ;;  %318 = vperm.xlu0 %581, %v153_v9   ;;  %v835_v63 = vsub.f32 %v30_v61, %v46_v62  ;;  %v162_v0 = vld [vmem:[%s1065_s2 + $0x78] sm:$0xff]  ;;  %v252_v9 = vsel %vm195_vm0, %v235_v6, 0.0  ;;  %v240_v51 = vand.u32 2147483647, %v732_v32  ;;  %v260_v52 = vsel %vm195_vm0, %v239_v40, 0.0 }
  0x14   :  { %v253_v13 = vadd.f32 %v252_v9, %v251_v7  ;;  %v241_v62 = vand.u32 2147483647, %v764_v42  ;;  %v242_v9 = vand.u32 2147483647, %v766_v43  ;;  %v243_v18 = vand.u32 2147483647, %v762_v41 }
  0x15   :  { %v262_v61 = vsel %vm195_vm0, %v240_v51, 0.0  ;;  %v934_v40 = vmul.f32 %v766_v43, %v766_v43 }
  0x16   :  { %v255_v27 = vadd.f32 %v254_v19, %v253_v13  ;;  %v264_v7 = vsel %vm195_vm0, %v241_v62, 0.0  ;;  %v266_v19 = vsel %vm195_vm0, %v242_v9, 0.0 }
  0x17   :  { %v213_v51 = vsel %vm195_vm0, %v934_v40, 0.0 }
  0x18   :  { %v257_v37 = vadd.f32 %v256_v29, %v255_v27 }
  0x1a   :  { %441 = vrot.lane.b32.xlu2 %v673_v14, %s611_s13  ;;  %v259_v49 = vadd.f32 %v258_v39, %v257_v37  ;;  %v244_v39 = vand.u32 2147483647, %v783_v47 }
  0x1b   :  { %333 = vperm.xlu0 %581, %v156_v16   ;;  %439 = vrot.lane.b32.xlu1 %v675_v15, %s611_s13  ;;  %v196_v16 = vsel %vm195_vm0, %v855_v11, 0.0 }
  0x1c   :  { %v198_v26 = vadd.f32 %v197_v17, %v196_v16  ;;  %v261_v57 = vadd.f32 %v260_v52, %v259_v49  ;;  %v209_v17 = vsel %vm195_vm0, %v916_v10, 0.0  ;;  %v270_v52 = vsel %vm195_vm0, %v244_v39, 0.0 }
  0x1d   :  { %v972_v39 = vmul.f32 %v804_v54, %v804_v54 }
  0x1e   :  { %v200_v36 = vadd.f32 %v199_v28, %v198_v26  ;;  %v263_v5 = vadd.f32 %v262_v61, %v261_v57  ;;  %v924_v26 = vmul.f32 %v764_v42, %v764_v42 }
  0x20   :  { %v265_v16 = vadd.f32 %v264_v7, %v263_v5  ;;  %v211_v37 = vsel %vm195_vm0, %v924_v26, 0.0 }
  0x22   :  { %447 = vrot.lane.b32.xlu2 %v702_v23, %s611_s13 }
  0x23   :  { %443 = vrot.lane.b32.xlu0 %v704_v24, %s611_s13  ;;  %445 = vrot.lane.b32.xlu1 %v706_v25, %s611_s13 }
  0x2a   :  { %453 = vrot.lane.b32.xlu2 %v732_v32, %s611_s13 }
  0x2b   :  { %449 = vrot.lane.b32.xlu0 %v734_v33, %s611_s13  ;;  %451 = vrot.lane.b32.xlu1 %v736_v34, %s611_s13 }
  0x32   :  { %459 = vrot.lane.b32.xlu2 %v762_v41, %s611_s13 }
  0x33   :  { %455 = vrot.lane.b32.xlu0 %v764_v42, %s611_s13  ;;  %457 = vrot.lane.b32.xlu1 %v766_v43, %s611_s13 }
  0x3a   :  { %343 = vperm.xlu2 %583, %v158_v46  }
  0x3b   :  { %338 = vperm.xlu0 %581, %v157_v48   ;;  %461 = vrot.lane.b32.xlu1 %v783_v47, %s611_s13  ;;  %v202_v48 = vadd.f32 %v201_v38, %v200_v36  ;;  %v267_v36 = vadd.f32 %v266_v19, %v265_v16  ;;  %v268_v38 = vsel %vm195_vm0, %v243_v18, 0.0 }
  0x3d   :  { %v204_v56 = vadd.f32 %v203_v50, %v202_v48  ;;  %v269_v49 = vadd.f32 %v268_v38, %v267_v36 }
  0x42   :  { %465 = vrot.lane.b32.xlu2 %v802_v53, %s611_s13 }
  0x43   :  { %463 = vrot.lane.b32.xlu0 %v804_v54, %s611_s13  ;;  %348 = vperm.xlu1 %582, %v159_v55   ;;  %v896_v55 = vmul.f32 %v734_v33, %v734_v33 }
  0x4a   :  { %358 = vperm.xlu2 %583, %v161_v58   ;;  %v205_v58 = vsel %vm195_vm0, %v896_v55, 0.0 }
  0x4b   :  { %353 = vperm.xlu0 %581, %v160_v60   ;;  %467 = vrot.lane.b32.xlu1 %v822_v59, %s611_s13  ;;  %v206_v4 = vadd.f32 %v205_v58, %v204_v56  ;;  %v245_v56 = vand.u32 2147483647, %v804_v54  ;;  %v943_v58 = vmul.f32 %v762_v41, %v762_v41 }
  0x4d   :  { %v215_v9 = vsel %vm195_vm0, %v943_v58, 0.0 }
  0x53   :  { %469 = vrot.lane.b32.xlu0 %v835_v63, %s611_s13  ;;  %363 = vperm.xlu1 %582, %v162_v0   ;;  %v904_v0 = vmul.f32 %v736_v34, %v736_v34 }
  0x55   :  { %v207_v6 = vsel %vm195_vm0, %v904_v0, 0.0 }
  0x56   :  { %v208_v13 = vadd.f32 %v207_v6, %v206_v4 }
  0x58   :  { %v210_v28 = vadd.f32 %v209_v17, %v208_v13 }
  0x5a   :  { %v212_v48 = vadd.f32 %v211_v37, %v210_v28 }
  0x5c   :  { %v842_v1 = vpop.permute.xlu2 %308  ;;  %v214_v62 = vadd.f32 %v213_v51, %v212_v48 }
  0x5e   :  { %v216_v19 = vadd.f32 %v215_v9, %v214_v62  ;;  %v987_v9 = vmul.f32 %v802_v53, %v802_v53 }
  0x64   :  { %v849_v8 = vpop.permute.xlu2 %313 }
  0x6c   :  { %v874_v31 = vpop.permute.xlu2 %328 }
  0x74   :  { %v442_v60 = vpop.permute.xlu2 %441 }
  0x75   :  { %v868_v21 = vpop.permute.xlu1 %298  ;;  %v289_v22 = vpop.permute.xlu0 %288  ;;  %v488_v61 = vsub.f32 %v673_v14, %v442_v60  ;;  %v960_v60 = vmul.f32 %v783_v47, %v783_v47 }
  0x76   :  { %v366_v57 = vmul.f32 %v289_v22, %v855_v11  ;;  %v272_v11 = vsel %vm195_vm0, %v245_v56, 0.0  ;;  %v246_v22 = vand.u32 2147483647, %v802_v53  ;;  %v368_v14 = vmul.f32 %v868_v21, %v866_v20 }
  0x77   :  { %v506_v16 = vmul.f32 %v488_v61, %v488_v61  ;;  %v219_v61 = vsel %vm195_vm0, %v972_v39, 0.0 }
  0x78   :  { %v274_v36 = vsel %vm195_vm0, %v246_v22, 0.0  ;;  %v385_v37 = vsel %vm195_vm0, %v368_v14, 0.0 }
  0x79   :  { %v523_v48 = vsel %vm521_vm1, %v506_v16, 0.0 }
  0x7c   :  { %v448_v27 = vpop.permute.xlu2 %447 }
  0x7d   :  { %v888_v45 = vpop.permute.xlu1 %303  ;;  %v294_v46 = vpop.permute.xlu0 %293 }
  0x7e   :  { %v367_v50 = vmul.f32 %v294_v46, %v180_v12  ;;  %v271_v46 = vadd.f32 %v270_v52, %v269_v49  ;;  %v369_v38 = vmul.f32 %v888_v45, %v878_v35  ;;  %v248_v35 = vand.u32 2147483647, %v835_v63 }
  0x7f   :  { %v491_v45 = vsub.f32 %v702_v23, %v448_v27  ;;  %v221_v23 = vsel %vm195_vm0, %v987_v9, 0.0 }
  0x80   :  { %v383_v6 = vsel %vm195_vm0, %v367_v50, 0.0  ;;  %v273_v28 = vadd.f32 %v272_v11, %v271_v46 }
  0x84   :  { %v948_v7 = vpop.permute.xlu2 %453 }
  0x85   :  { %v906_v2 = vpop.permute.xlu1 %323  ;;  %v908_v3 = vpop.permute.xlu0 %318 }
  0x8c   :  { %v460_v46 = vpop.permute.xlu2 %459 }
  0x8d   :  { %v926_v29 = vpop.permute.xlu0 %333  ;;  %v440_v30 = vpop.permute.xlu1 %439 }
  0x8e   :  { %v487_v4 = vsub.f32 %v675_v15, %v440_v30  ;;  %v382_v15 = vsel %vm195_vm0, %v366_v57, 0.0  ;;  %v247_v30 = vand.u32 2147483647, %v822_v59  ;;  %v275_v57 = vadd.f32 %v274_v36, %v273_v28 }
  0x8f   :  { %v384_v17 = vadd.f32 %v383_v6, %v382_v15  ;;  %v509_v15 = vmul.f32 %v491_v45, %v491_v45 }
  0x90   :  { %v505_v18 = vmul.f32 %v487_v4, %v487_v4 }
  0x91   :  { %v386_v49 = vadd.f32 %v385_v37, %v384_v17  ;;  %v371_v17 = vmul.f32 %v849_v8, %v896_v55  ;;  %v372_v55 = vmul.f32 %v908_v3, %v904_v0 }
  0x92   :  { %v522_v50 = vsel %vm521_vm1, %v505_v18, 0.0  ;;  %v999_v18 = vmul.f32 %v822_v59, %v822_v59 }
  0x93   :  { %v524_v6 = vadd.f32 %v523_v48, %v522_v50  ;;  %v391_v8 = vsel %vm195_vm0, %v371_v17, 0.0  ;;  %v494_v48 = vsub.f32 %v732_v32, %v948_v7  ;;  %v373_v32 = vmul.f32 %v906_v2, %v916_v10 }
  0x94   :  { %v393_v3 = vsel %vm195_vm0, %v372_v55, 0.0 }
  0x95   :  { %v444_v5 = vpop.permute.xlu0 %443  ;;  %v446_v12 = vpop.permute.xlu1 %445  ;;  %v512_v7 = vmul.f32 %v494_v48, %v494_v48 }
  0x96   :  { %v489_v13 = vsub.f32 %v704_v24, %v444_v5  ;;  %v217_v24 = vsel %vm195_vm0, %v960_v60, 0.0  ;;  %v490_v21 = vsub.f32 %v706_v25, %v446_v12  ;;  %v276_v25 = vsel %vm195_vm0, %v247_v30, 0.0 }
  0x97   :  { %v218_v56 = vadd.f32 %v217_v24, %v216_v19  ;;  %v370_v5 = vmul.f32 %v842_v1, %v886_v44  ;;  %v387_v12 = vsel %vm195_vm0, %v369_v38, 0.0  ;;  %v277_v27 = vadd.f32 %v276_v25, %v275_v57 }
  0x98   :  { %v507_v20 = vmul.f32 %v489_v13, %v489_v13  ;;  %v508_v4 = vmul.f32 %v490_v21, %v490_v21  ;;  %v388_v11 = vadd.f32 %v387_v12, %v386_v49  ;;  %v278_v44 = vsel %vm195_vm0, %v248_v35, 0.0 }
  0x99   :  { %v220_v13 = vadd.f32 %v219_v61, %v218_v56  ;;  %v389_v16 = vsel %vm195_vm0, %v370_v5, 0.0  ;;  %v223_v21 = vsel %vm195_vm0, %v999_v18, 0.0  ;;  %v279_v37 = vadd.f32 %v278_v44, %v277_v27  ;;  %v344_v56 = vpop.permute.xlu2 %343 }
  0x9a   :  { %v525_v62 = vsel %vm521_vm1, %v507_v20, 0.0  ;;  %v527_v1 = vsel %vm521_vm1, %v508_v4, 0.0  ;;  %v529_v38 = vsel %vm521_vm1, %v509_v15, 0.0  ;;  %v535_v27 = vsel %vm521_vm1, %v512_v7, 0.0 }
  0x9b   :  { %v526_v14 = vadd.f32 %v525_v62, %v524_v6  ;;  %v222_v36 = vadd.f32 %v221_v23, %v220_v13  ;;  %v280_v6 = vrot.slane %v279_v37, 4  ;;  %v375_v44 = vmul.f32 %v926_v29, %v934_v40 }
  0x9d   :  { %v450_v51 = vpop.permute.xlu0 %449  ;;  %v452_v52 = vpop.permute.xlu1 %451  ;;  %v528_v20 = vadd.f32 %v527_v1, %v526_v14  ;;  %v281_v13 = vadd.f32 %v280_v6, %v279_v37  ;;  %v395_v14 = vsel %vm195_vm0, %v373_v32, 0.0  ;;  %v399_v29 = vsel %vm195_vm0, %v375_v44, 0.0 }
  0x9e   :  { %v492_v22 = vsub.f32 %v734_v33, %v450_v51  ;;  %v390_v33 = vadd.f32 %v389_v16, %v388_v11  ;;  %v493_v28 = vsub.f32 %v736_v34, %v452_v52  ;;  %v1012_v34 = vmul.f32 %v835_v63, %v835_v63 }
  0x9f   :  { %v224_v52 = vadd.f32 %v223_v21, %v222_v36  ;;  %v530_v57 = vadd.f32 %v529_v38, %v528_v20  ;;  %v282_v1 = vrot.slane %v281_v13, 2  ;;  %v497_v16 = vsub.f32 %v762_v41, %v460_v46 }
  0xa0   :  { %v510_v19 = vmul.f32 %v492_v22, %v492_v22  ;;  %v392_v49 = vadd.f32 %v391_v8, %v390_v33  ;;  %v511_v51 = vmul.f32 %v493_v28, %v493_v28  ;;  %v225_v25 = vsel %vm195_vm0, %v1012_v34, 0.0 }
  0xa1   :  { %v226_v0 = vadd.f32 %v225_v25, %v224_v52  ;;  %v515_v40 = vmul.f32 %v497_v16, %v497_v16 }
  0xa2   :  { %v531_v50 = vsel %vm521_vm1, %v510_v19, 0.0  ;;  %v394_v45 = vadd.f32 %v393_v3, %v392_v49  ;;  %v533_v62 = vsel %vm521_vm1, %v511_v51, 0.0  ;;  %v283_v19 = vadd.f32 %v282_v1, %v281_v13 }
  0xa3   :  { %v532_v35 = vadd.f32 %v531_v50, %v530_v57  ;;  %v227_v12 = vrot.slane %v226_v0, 4  ;;  %v612_v49 = vmov 0.0   ;;  %v377_v51 = vmul.f32 %v344_v56, %v960_v60 }
  0xa4   :  { %v396_v23 = vadd.f32 %v395_v14, %v394_v45  ;;  %v284_v37 = vrot.slane %v283_v19, 1  ;;  %504 = vst.msk [vmem:[#allocation2 + $0x3] sm:$0x1] %vm503_vm2, %v612_v49 }
  0xa5   :  { %v456_v30 = vpop.permute.xlu0 %455  ;;  %v458_v24 = vpop.permute.xlu1 %457  ;;  %v228_v22 = vadd.f32 %v227_v12, %v226_v0  ;;  %v534_v2 = vadd.f32 %v533_v62, %v532_v35  ;;  %v403_v32 = vsel %vm195_vm0, %v377_v51, 0.0 }
  0xa6   :  { %v495_v61 = vsub.f32 %v764_v42, %v456_v30  ;;  %v374_v42 = vmul.f32 %v874_v31, %v924_v26  ;;  %v496_v10 = vsub.f32 %v766_v43, %v458_v24  ;;  %v466_v26 = vpop.permute.xlu2 %465  ;;  %v285_v8 = vadd.f32 %v284_v37, %v283_v19 }
  0xa7   :  { %v229_v15 = vrot.slane %v228_v22, 2  ;;  %v536_v28 = vadd.f32 %v535_v27, %v534_v2  ;;  %v500_v0 = vsub.f32 %v802_v53, %v466_v26 }
  0xa8   :  { %v513_v11 = vmul.f32 %v495_v61, %v495_v61  ;;  %v397_v31 = vsel %vm195_vm0, %v374_v42, 0.0  ;;  %v514_v30 = vmul.f32 %v496_v10, %v496_v10  ;;  %421 = vst.msk [vmem:[#allocation2 + $0x1] sm:$0x1] %vm419_vm3, %v285_v8  ;;  %v541_v61 = vsel %vm521_vm1, %v515_v40, 0.0 }
  0xa9   :  { %v230_v33 = vadd.f32 %v229_v15, %v228_v22  ;;  %v398_v24 = vadd.f32 %v397_v31, %v396_v23 }
  0xaa   :  { %v537_v17 = vsel %vm521_vm1, %v513_v11, 0.0  ;;  %v539_v55 = vsel %vm521_vm1, %v514_v30, 0.0 }
  0xab   :  { %v231_v21 = vrot.slane %v230_v33, 1  ;;  %v538_v41 = vadd.f32 %v537_v17, %v536_v28  ;;  %v400_v50 = vadd.f32 %v399_v29, %v398_v24 }
  0xad   :  { %v339_v4 = vpop.permute.xlu0 %338  ;;  %v462_v5 = vpop.permute.xlu1 %461  ;;  %v232_v38 = vadd.f32 %v231_v21, %v230_v33  ;;  %v540_v57 = vadd.f32 %v539_v55, %v538_v41 }
  0xae   :  { %v376_v43 = vmul.f32 %v339_v4, %v943_v58  ;;  %v498_v46 = vsub.f32 %v783_v47, %v462_v5  ;;  %v359_v45 = vpop.permute.xlu2 %358  ;;  %v518_v5 = vmul.f32 %v500_v0, %v500_v0 }
  0xaf   :  { %420 = vst.msk [vmem:[#allocation2] sm:$0x1] %vm419_vm3, %v232_v38  ;;  %v542_v62 = vadd.f32 %v541_v61, %v540_v57  ;;  %v380_v22 = vmul.f32 %v359_v45, %v999_v18 }
  0xb0   :  { %v401_v48 = vsel %vm195_vm0, %v376_v43, 0.0  ;;  %v516_v52 = vmul.f32 %v498_v46, %v498_v46  ;;  %v547_v2 = vsel %vm521_vm1, %v518_v5, 0.0 }
  0xb1   :  { %v402_v25 = vadd.f32 %v401_v48, %v400_v50 }
  0xb2   :  { %v543_v60 = vsel %vm521_vm1, %v516_v52, 0.0 }
  0xb3   :  { %v404_v4 = vadd.f32 %v403_v32, %v402_v25  ;;  %v544_v6 = vadd.f32 %v543_v60, %v542_v62 }
  0xb5   :  { %v464_v36 = vpop.permute.xlu0 %463  ;;  %v349_v20 = vpop.permute.xlu1 %348 }
  0xb6   :  { %v499_v58 = vsub.f32 %v804_v54, %v464_v36  ;;  %v378_v47 = vmul.f32 %v349_v20, %v972_v39 }
  0xb8   :  { %v517_v54 = vmul.f32 %v499_v58, %v499_v58  ;;  %v405_v56 = vsel %vm195_vm0, %v378_v47, 0.0 }
  0xb9   :  { %v406_v11 = vadd.f32 %v405_v56, %v404_v4 }
  0xba   :  { %v545_v12 = vsel %vm521_vm1, %v517_v54, 0.0 }
  0xbb   :  { %v546_v42 = vadd.f32 %v545_v12, %v544_v6 }
  0xbd   :  { %v354_v3 = vpop.permute.xlu0 %353  ;;  %v468_v7 = vpop.permute.xlu1 %467  ;;  %v548_v1 = vadd.f32 %v547_v2, %v546_v42 }
  0xbe   :  { %v379_v35 = vmul.f32 %v354_v3, %v987_v9  ;;  %v501_v39 = vsub.f32 %v822_v59, %v468_v7  ;;  %v409_v59 = vsel %vm195_vm0, %v380_v22, 0.0 }
  0xc0   :  { %v407_v53 = vsel %vm195_vm0, %v379_v35, 0.0  ;;  %v519_v13 = vmul.f32 %v501_v39, %v501_v39 }
  0xc1   :  { %v408_v14 = vadd.f32 %v407_v53, %v406_v11 }
  0xc2   :  { %v549_v23 = vsel %vm521_vm1, %v519_v13, 0.0 }
  0xc3   :  { %v410_v44 = vadd.f32 %v409_v59, %v408_v14  ;;  %v550_v17 = vadd.f32 %v549_v23, %v548_v1 }
  0xc5   :  { %v470_v9 = vpop.permute.xlu0 %469  ;;  %v364_v10 = vpop.permute.xlu1 %363 }
  0xc6   :  { %v502_v27 = vsub.f32 %v835_v63, %v470_v9  ;;  %v381_v15 = vmul.f32 %v364_v10, %v1012_v34 }
  0xc8   :  { %v520_v16 = vmul.f32 %v502_v27, %v502_v27  ;;  %v411_v18 = vsel %vm195_vm0, %v381_v15, 0.0 }
  0xc9   :  { %v412_v33 = vadd.f32 %v411_v18, %v410_v44 }
  0xca   :  { %v551_v19 = vsel %vm521_vm1, %v520_v16, 0.0 }
  0xcb   :  { %v552_v31 = vadd.f32 %v551_v19, %v550_v17  ;;  %v413_v26 = vrot.slane %v412_v33, 4 }
  0xcd   :  { %v553_v28 = vrot.slane %v552_v31, 4  ;;  %v414_v30 = vadd.f32 %v413_v26, %v412_v33 }
  0xcf   :  { %v554_v43 = vadd.f32 %v553_v28, %v552_v31  ;;  %v415_v24 = vrot.slane %v414_v30, 2 }
  0xd1   :  { %v555_v36 = vrot.slane %v554_v43, 2  ;;  %v416_v20 = vadd.f32 %v415_v24, %v414_v30 }
  0xd3   :  { %v556_v63 = vadd.f32 %v555_v36, %v554_v43  ;;  %v417_v21 = vrot.slane %v416_v20, 1 }
  0xd5   :  { %v557_v34 = vrot.slane %v556_v63, 1  ;;  %v418_v37 = vadd.f32 %v417_v21, %v416_v20 }
  0xd7   :  { %v558_v29 = vadd.f32 %v557_v34, %v556_v63  ;;  %422 = vst.msk [vmem:[#allocation2 + $0x2] sm:$0x1] %vm419_vm3, %v418_v37 }
  0xd9   :  { %560 = vst.msk [vmem:[#allocation2 + $0x3] sm:$0x1] %vm559_vm4, %v558_v29 }
  0xda   :  { %571 = dma.vmem_to_hbm [thread:$0]  %s567_s1, 64, %s569_s30, [#allocation3]  }
  0xdb   :  { %608 = dma.done.wait [#allocation3], 64  }
  0xdc   :  { %609 = vsyncadd [#allocation3], 4294967232 }
  0xdd   :  { %576 = vsyncpa [#allocation3], 1 }

</bundles_post_ra>
